<compile_context>
chip_gen: v7x
topology: tpu7x:2x2x1
jax: 0.10.0
libtpu: 0.0.40
codegen_flags: <defaults>
</compile_context>

<pallas_src>
import functools

import jax
import jax.numpy as jnp
import numpy as np
from jax.experimental import pallas as pl
from jax.experimental.pallas import tpu as pltpu


def _gmm_vpu_kernel(xt_ref, mu_ref, coef_ref, logc_ref, w_ref, out_ref, *,
                    tile_n, tiles_per_chunk, n_valid, dims, needs_mask):
    """Lanes-major path (small D/K): samples on lanes, clusters on sublanes.

    Accumulates per-(cluster, sample) densities into the resident (1, K, tile_n)
    output block of the current chunk; reductions happen in the JAX wrapper.
    """
    c = pl.program_id(0)   # chunk (parallel)
    t = pl.program_id(1)   # tile within chunk (reduction / accumulation)

    @pl.when(t == 0)
    def _():
        out_ref[...] = jnp.zeros_like(out_ref)

    xt = xt_ref[...].astype(jnp.float32)       # (D, TN)  samples on lanes
    mu = mu_ref[...].astype(jnp.float32)       # (K, D)
    coef = coef_ref[...]                       # (K, 1)  == -0.5 / exp(cov)
    logc = logc_ref[...]                       # (K, 1)  hoisted log-constants
    w = w_ref[...]                             # (K, 1)

    k = mu.shape[0]
    dist2 = jnp.zeros((k, tile_n), jnp.float32)
    for d in range(dims):                      # unrolled over features (D is tiny)
        diff = xt[d:d + 1, :] - mu[:, d:d + 1]                      # (K, TN)
        dist2 = dist2 + diff * diff
    dens = w * jnp.exp(logc + coef * dist2)                         # (K, TN)

    if needs_mask:
        # Zero out contributions from padded sample lanes (only in the last tiles).
        col0 = (c * tiles_per_chunk + t) * tile_n
        cols = col0 + jax.lax.broadcasted_iota(jnp.int32, (1, tile_n), 1)
        dens = jnp.where(cols < n_valid, dens, 0.0)

    out_ref[...] += dens[None]                                      # (1, K, TN)


def _gmm_mxu_kernel(x_ref, mu_t_ref, coef_ref, logc_ref, w_ref, out_ref, *,
                    tile_n, tiles_per_chunk, n_valid, needs_mask):
    """Samples-major MXU path (large D/K): ||x-mu||^2 via ||x||^2 + ||mu||^2 - 2<x,mu>.

    coef*||mu||^2 is folded into logc in the wrapper. Emits per-cluster partial sums
    into the resident (1, 1, K) output block of the current chunk.
    """
    c = pl.program_id(0)
    t = pl.program_id(1)

    @pl.when(t == 0)
    def _():
        out_ref[...] = jnp.zeros_like(out_ref)

    x = x_ref[...].astype(jnp.float32)             # (TN, D)
    mu_t = mu_t_ref[...].astype(jnp.float32)       # (D, K)
    coef = coef_ref[...]                           # (1, K)
    logc = logc_ref[...]                           # (1, K)  includes coef*||mu||^2
    w = w_ref[...]                                 # (1, K)

    x2 = jnp.sum(x * x, axis=1, keepdims=True)                         # (TN, 1)
    xmu = jnp.dot(x, mu_t, preferred_element_type=jnp.float32)         # (TN, K) MXU
    dens = w * jnp.exp(logc + coef * (x2 - 2.0 * xmu))                 # (TN, K)

    if needs_mask:
        row0 = (c * tiles_per_chunk + t) * tile_n
        rows = row0 + jax.lax.broadcasted_iota(jnp.int32, (tile_n, 1), 0)
        dens = jnp.where(rows < n_valid, dens, 0.0)

    out_ref[...] += jnp.sum(dens, axis=0, keepdims=True)[None]         # (1, 1, K)


def gmm_mle_loss(x, means, covariances, weights, labels=None, *,
                 tile_n=2048, num_chunks=2, use_mxu=None):
    """Pallas GMM-MLE loss. x: (N, D) f32, means: (K, D), covariances: (K,), weights: (K,)."""
    del labels  # unused by the reference forward()
    N, D = x.shape
    K = means.shape[0]

    if use_mxu is None:
        use_mxu = (D >= 128 and K >= 128)

    # --- tiling ------------------------------------------------------------
    num_chunks = max(1, int(num_chunks))
    lane = 128
    tile_n = max(lane, (int(tile_n) // lane) * lane)
    # Don't massively over-pad tiny inputs: shrink the tile to ~N/num_chunks.
    per_chunk = pl.cdiv(N, num_chunks)
    tile_n = min(tile_n, max(lane, pl.cdiv(per_chunk, lane) * lane))
    tiles_per_chunk = pl.cdiv(N, num_chunks * tile_n)
    n_pad = num_chunks * tiles_per_chunk * tile_n
    needs_mask = (n_pad != N)

    x = x.astype(jnp.float32)
    if needs_mask:
        x = jnp.pad(x, ((0, n_pad - N), (0, 0)))

    # --- hoisted per-cluster constants --------------------------------------
    cov32 = covariances.astype(jnp.float32)
    var = jnp.exp(cov32)                                   # (K,)
    coef = -0.5 / var                                      # (K,)
    log2pi = float(np.log(2.0 * np.pi))
    logc = -0.5 * (D * log2pi + D * cov32)                 # (K,)
    w32 = weights.astype(jnp.float32)
    mu32 = means.astype(jnp.float32)

    if use_mxu:
        logc_mxu = logc + coef * jnp.sum(mu32 * mu32, axis=1)
        kernel = functools.partial(
            _gmm_mxu_kernel, tile_n=tile_n, tiles_per_chunk=tiles_per_chunk,
            n_valid=N, needs_mask=needs_mask)
        partials = pl.pallas_call(
            kernel,
            out_shape=jax.ShapeDtypeStruct((num_chunks, 1, K), jnp.float32),
            grid_spec=pltpu.PrefetchScalarGridSpec(
                num_scalar_prefetch=0,
                grid=(num_chunks, tiles_per_chunk),
                in_specs=[
                    pl.BlockSpec((tile_n, D), lambda c, t: (c * tiles_per_chunk + t, 0)),
                    pl.BlockSpec((D, K), lambda c, t: (0, 0)),   # means^T (grid-invariant)
                    pl.BlockSpec((1, K), lambda c, t: (0, 0)),   # -0.5/var
                    pl.BlockSpec((1, K), lambda c, t: (0, 0)),   # log-constants
                    pl.BlockSpec((1, K), lambda c, t: (0, 0)),   # weights
                ],
                out_specs=pl.BlockSpec((1, 1, K), lambda c, t: (c, 0, 0)),
            ),
            compiler_params=pltpu.CompilerParams(
                dimension_semantics=("parallel", "arbitrary")),
        )(x, jnp.transpose(mu32), coef.reshape(1, K), logc_mxu.reshape(1, K),
          w32.reshape(1, K))
    else:
        # Lanes-major layout: samples on the 128-wide lane axis, clusters on sublanes.
        x_t = jnp.transpose(x)                             # (D, n_pad)
        kernel = functools.partial(
            _gmm_vpu_kernel, tile_n=tile_n, tiles_per_chunk=tiles_per_chunk,
            n_valid=N, dims=D, needs_mask=needs_mask)
        partials = pl.pallas_call(
            kernel,
            out_shape=jax.ShapeDtypeStruct((num_chunks, K, tile_n), jnp.float32),
            grid_spec=pltpu.PrefetchScalarGridSpec(
                num_scalar_prefetch=0,
                grid=(num_chunks, tiles_per_chunk),
                in_specs=[
                    pl.BlockSpec((D, tile_n), lambda c, t: (0, c * tiles_per_chunk + t)),
                    pl.BlockSpec((K, D), lambda c, t: (0, 0)),   # means (grid-invariant)
                    pl.BlockSpec((K, 1), lambda c, t: (0, 0)),   # -0.5/var
                    pl.BlockSpec((K, 1), lambda c, t: (0, 0)),   # log-constants
                    pl.BlockSpec((K, 1), lambda c, t: (0, 0)),   # weights
                ],
                out_specs=pl.BlockSpec((1, K, tile_n), lambda c, t: (c, 0, 0)),
            ),
            compiler_params=pltpu.CompilerParams(
                dimension_semantics=("parallel", "arbitrary")),
        )(x_t, mu32, coef.reshape(K, 1), logc.reshape(K, 1), w32.reshape(K, 1))

    # Finalize in plain JAX: tiny, and keeps the grid shardable across cores.
    dens_sum = jnp.sum(partials)
    mean_d = dens_sum / jnp.float32(N * K)
    return -jnp.log(mean_d) + (1.0 - jnp.mean(w32))


def gmm_mle_loss_ref(x, means, covariances, weights):
    """Pure-JAX reference mirroring the PyTorch forward."""
    D = x.shape[1]
    var = jnp.exp(covariances)                                   # (K,)
    diff = x[:, None, :] - means[None, :, :]                     # (N, K, D)
    dist2 = jnp.sum(diff * diff, axis=-1)                        # (N, K)
    logp = -0.5 * (D * jnp.log(2.0 * jnp.pi)
                   + D * covariances[None, :]
                   + dist2 / var[None, :])
    dens = weights[None, :] * jnp.exp(logp)
    return -jnp.log(jnp.mean(dens)) + (1.0 - jnp.mean(weights))


if __name__ == "__main__":
    # Module-consistent shapes: means (K, D), covariances (K,), weights (K,), D=2.
    num_clusters, dims = 8, 2
    key = jax.random.PRNGKey(0)
    kx, km, kc, kx2 = jax.random.split(key, 4)

    means = jax.random.normal(km, (num_clusters, dims), dtype=jnp.float32)
    covariances = jax.random.normal(kc, (num_clusters,), dtype=jnp.float32) ** 2
    weights = jnp.ones((num_clusters,), dtype=jnp.float32) / num_clusters

    # 1) Small case (N=16): lanes-major VPU path, single masked tile.
    x_small = jax.random.normal(kx, (16, dims), dtype=jnp.float32)
    out = jax.block_until_ready(
        gmm_mle_loss(x_small, means, covariances, weights, labels=None))
    ref = jax.block_until_ready(gmm_mle_loss_ref(x_small, means, covariances, weights))
    np.testing.assert_allclose(np.asarray(out), np.asarray(ref), rtol=1e-5, atol=1e-5)

    # 2) Larger non-multiple N: big lane-dense tiles + masked remainder, VPU path.
    x_big = jax.random.normal(kx2, (3000, dims), dtype=jnp.float32)
    out2 = jax.block_until_ready(gmm_mle_loss(x_big, means, covariances, weights))
    ref2 = jax.block_until_ready(gmm_mle_loss_ref(x_big, means, covariances, weights))
    np.testing.assert_allclose(np.asarray(out2), np.asarray(ref2), rtol=1e-4, atol=1e-4)

    # 3) Same data through the MXU (||x||^2 + ||mu||^2 - 2<x,mu>) formulation.
    out3 = jax.block_until_ready(
        gmm_mle_loss(x_big, means, covariances, weights, use_mxu=True))
    np.testing.assert_allclose(np.asarray(out3), np.asarray(ref2), rtol=1e-4, atol=1e-4)

    print("KERNEL_OK")
</pallas_src>

<mosaic_0001>
module attributes {stable_mosaic.version = 11 : i64} {
  func.func @_gmm_vpu_kernel(%arg0: i32, %arg1: i32, %arg2: memref<2x128xf32, #tpu.memory_space<vmem>>, %arg3: memref<8x2xf32, #tpu.memory_space<vmem>>, %arg4: memref<8x1xf32, #tpu.memory_space<vmem>>, %arg5: memref<8x1xf32, #tpu.memory_space<vmem>>, %arg6: memref<8x1xf32, #tpu.memory_space<vmem>>, %arg7: memref<1x8x128xf32, #tpu.memory_space<vmem>>) attributes {dimension_semantics = [#tpu.dimension_semantics<parallel>, #tpu.dimension_semantics<arbitrary>], iteration_bounds = array<i64: 2, 1>, scalar_prefetch = 0 : i64, scratch_operands = 0 : i64, tpu.core_type = #tpu.core_type<tc>, window_params = [{transform_indices = @transform_0, window_bounds = array<i64: 2, 128>}, {pipeline_mode = #tpu.pipeline_mode<synchronous>, transform_indices = @transform_1, window_bounds = array<i64: 8, 2>}, {pipeline_mode = #tpu.pipeline_mode<synchronous>, transform_indices = @transform_2, window_bounds = array<i64: 8, 1>}, {pipeline_mode = #tpu.pipeline_mode<synchronous>, transform_indices = @transform_3, window_bounds = array<i64: 8, 1>}, {pipeline_mode = #tpu.pipeline_mode<synchronous>, transform_indices = @transform_4, window_bounds = array<i64: 8, 1>}, {transform_indices = @transform_5, window_bounds = array<i64: 1, 8, 128>}]} {
    %c0_i32 = arith.constant 0 : i32
    %0 = arith.cmpi eq, %arg1, %c0_i32 : i32
    %1 = arith.extui %0 : i1 to i32
    %c0_i32_0 = arith.constant 0 : i32
    %2 = arith.cmpi ne, %1, %c0_i32_0 : i32
    scf.if %2 {
      %cst_17 = arith.constant 0.000000e+00 : f32
      %46 = vector.broadcast %cst_17 : f32 to vector<1x8x128xf32>
      %c0_18 = arith.constant 0 : index
      %c0_19 = arith.constant 0 : index
      %c0_20 = arith.constant 0 : index
      %47 = vector.load %arg7[%c0_18, %c0_19, %c0_20] : memref<1x8x128xf32, #tpu.memory_space<vmem>>, vector<1x8x128xf32>
      tpu.vector_store %arg7[%c0_18, %c0_19, %c0_20], %46 {strides = array<i32>} : memref<1x8x128xf32, #tpu.memory_space<vmem>>, vector<1x8x128xf32>,
    } else {
    }
    %c0 = arith.constant 0 : index
    %c0_1 = arith.constant 0 : index
    %3 = vector.load %arg2[%c0, %c0_1] : memref<2x128xf32, #tpu.memory_space<vmem>>, vector<2x128xf32>
    %c0_2 = arith.constant 0 : index
    %c0_3 = arith.constant 0 : index
    %4 = vector.load %arg3[%c0_2, %c0_3] : memref<8x2xf32, #tpu.memory_space<vmem>>, vector<8x2xf32>
    %c0_4 = arith.constant 0 : index
    %c0_5 = arith.constant 0 : index
    %5 = vector.load %arg4[%c0_4, %c0_5] : memref<8x1xf32, #tpu.memory_space<vmem>>, vector<8x1xf32>
    %c0_6 = arith.constant 0 : index
    %c0_7 = arith.constant 0 : index
    %6 = vector.load %arg5[%c0_6, %c0_7] : memref<8x1xf32, #tpu.memory_space<vmem>>, vector<8x1xf32>
    %c0_8 = arith.constant 0 : index
    %c0_9 = arith.constant 0 : index
    %7 = vector.load %arg6[%c0_8, %c0_9] : memref<8x1xf32, #tpu.memory_space<vmem>>, vector<8x1xf32>
    %cst = arith.constant 0.000000e+00 : f32
    %8 = vector.broadcast %cst : f32 to vector<8x128xf32>
    %9 = vector.extract_strided_slice %3 {offsets = [0, 0], sizes = [1, 128], strides = [1, 1]} : vector<2x128xf32> to vector<1x128xf32>
    %10 = vector.extract_strided_slice %4 {offsets = [0, 0], sizes = [8, 1], strides = [1, 1]} : vector<8x2xf32> to vector<8x1xf32>
    %11 = vector.broadcast %9 : vector<1x128xf32> to vector<8x128xf32>
    %12 = vector.broadcast %10 : vector<8x1xf32> to vector<8x128xf32>
    %13 = arith.subf %11, %12 : vector<8x128xf32>
    %14 = arith.mulf %13, %13 : vector<8x128xf32>
    %15 = arith.addf %8, %14 : vector<8x128xf32>
    %16 = vector.extract_strided_slice %3 {offsets = [1, 0], sizes = [1, 128], strides = [1, 1]} : vector<2x128xf32> to vector<1x128xf32>
    %17 = vector.extract_strided_slice %4 {offsets = [0, 1], sizes = [8, 1], strides = [1, 1]} : vector<8x2xf32> to vector<8x1xf32>
    %18 = vector.broadcast %16 : vector<1x128xf32> to vector<8x128xf32>
    %19 = vector.broadcast %17 : vector<8x1xf32> to vector<8x128xf32>
    %20 = arith.subf %18, %19 : vector<8x128xf32>
    %21 = arith.mulf %20, %20 : vector<8x128xf32>
    %22 = arith.addf %15, %21 : vector<8x128xf32>
    %23 = vector.broadcast %5 : vector<8x1xf32> to vector<8x128xf32>
    %24 = arith.mulf %23, %22 : vector<8x128xf32>
    %25 = vector.broadcast %6 : vector<8x1xf32> to vector<8x128xf32>
    %26 = arith.addf %25, %24 : vector<8x128xf32>
    %27 = math.exp %26 : vector<8x128xf32>
    %28 = vector.broadcast %7 : vector<8x1xf32> to vector<8x128xf32>
    %29 = arith.mulf %28, %27 : vector<8x128xf32>
    %c1_i32 = arith.constant 1 : i32
    %30 = arith.muli %arg0, %c1_i32 : i32
    %31 = arith.addi %30, %arg1 : i32
    %c128_i32 = arith.constant 128 : i32
    %32 = arith.muli %31, %c128_i32 : i32
    %33 = tpu.iota {dimensions = array<i32: 1>} : vector<1x128xi32>
    %34 = vector.broadcast %32 : i32 to vector<1x128xi32>
    %35 = arith.addi %34, %33 : vector<1x128xi32>
    %c16_i32 = arith.constant 16 : i32
    %36 = vector.broadcast %c16_i32 : i32 to vector<1x128xi32>
    %37 = arith.cmpi slt, %35, %36 : vector<1x128xi32>
    %cst_10 = arith.constant 0.000000e+00 : f32
    %38 = vector.shape_cast %37 : vector<1x128xi1> to vector<1x128xi1>
    %39 = vector.broadcast %38 : vector<1x128xi1> to vector<8x128xi1>
    %40 = vector.broadcast %cst_10 : f32 to vector<8x128xf32>
    %41 = arith.select %39, %29, %40 : vector<8x128xi1>, vector<8x128xf32>
    %c0_11 = arith.constant 0 : index
    %c0_12 = arith.constant 0 : index
    %c0_13 = arith.constant 0 : index
    %42 = vector.load %arg7[%c0_11, %c0_12, %c0_13] : memref<1x8x128xf32, #tpu.memory_space<vmem>>, vector<1x8x128xf32>
    %43 = vector.shape_cast %41 : vector<8x128xf32> to vector<1x8x128xf32>
    %44 = arith.addf %42, %43 : vector<1x8x128xf32>
    %c0_14 = arith.constant 0 : index
    %c0_15 = arith.constant 0 : index
    %c0_16 = arith.constant 0 : index
    %45 = vector.load %arg7[%c0_14, %c0_15, %c0_16] : memref<1x8x128xf32, #tpu.memory_space<vmem>>, vector<1x8x128xf32>
    tpu.vector_store %arg7[%c0_14, %c0_15, %c0_16], %44 {strides = array<i32>} : memref<1x8x128xf32, #tpu.memory_space<vmem>>, vector<1x8x128xf32>,
    return
  }
  func.func @transform_0(%arg0: i32, %arg1: i32) -> (i32, i32) {
    %c1_i32 = arith.constant 1 : i32
    %0 = arith.muli %arg0, %c1_i32 : i32
    %1 = arith.addi %0, %arg1 : i32
    %c0_i32 = arith.constant 0 : i32
    %c0_i32_0 = arith.constant 0 : i32
    return %c0_i32, %1 : i32, i32
  }
  func.func @transform_1(%arg0: i32, %arg1: i32) -> (i32, i32) {
    %c0_i32 = arith.constant 0 : i32
    %c0_i32_0 = arith.constant 0 : i32
    %c0_i32_1 = arith.constant 0 : i32
    return %c0_i32, %c0_i32_0 : i32, i32
  }
  func.func @transform_2(%arg0: i32, %arg1: i32) -> (i32, i32) {
    %c0_i32 = arith.constant 0 : i32
    %c0_i32_0 = arith.constant 0 : i32
    %c0_i32_1 = arith.constant 0 : i32
    return %c0_i32, %c0_i32_0 : i32, i32
  }
  func.func @transform_3(%arg0: i32, %arg1: i32) -> (i32, i32) {
    %c0_i32 = arith.constant 0 : i32
    %c0_i32_0 = arith.constant 0 : i32
    %c0_i32_1 = arith.constant 0 : i32
    return %c0_i32, %c0_i32_0 : i32, i32
  }
  func.func @transform_4(%arg0: i32, %arg1: i32) -> (i32, i32) {
    %c0_i32 = arith.constant 0 : i32
    %c0_i32_0 = arith.constant 0 : i32
    %c0_i32_1 = arith.constant 0 : i32
    return %c0_i32, %c0_i32_0 : i32, i32
  }
  func.func @transform_5(%arg0: i32, %arg1: i32) -> (i32, i32, i32) {
    %c0_i32 = arith.constant 0 : i32
    %c0_i32_0 = arith.constant 0 : i32
    %c0_i32_1 = arith.constant 0 : i32
    return %arg0, %c0_i32, %c0_i32_0 : i32, i32, i32
  }
}

</mosaic_0001>

<bundles_post_ra>
// kernel: tpu_custom_call.1
= control target key start
LH: loop header
LB: loop body
LE: loop exit
PB: predicated region body
PF: predicated region fallthrough
CT: control target
= control target key end

     0   :  { %10 = vsyncpa [#allocation3], 0  ;;  %s699_s0 = inlined_call_operand.vmem [shape: f32[2,256], index: 0, kind: input, shape index: {}]   ;;  %s700_s1 = inlined_call_operand.vmem [shape: f32[8,2], index: 1, kind: input, shape index: {}]   ;;  %s701_s2 = inlined_call_operand.vmem [shape: f32[8,1], index: 2, kind: input, shape index: {}]   ;;  %s702_s3 = inlined_call_operand.vmem [shape: f32[8,1], index: 3, kind: input, shape index: {}]   ;;  %s703_s4 = inlined_call_operand.vmem [shape: f32[8,1], index: 4, kind: input, shape index: {}]   ;;  %s704_s5 = inlined_call_operand.hbm [shape: f32[2,8,128], index: 5, kind: output, shape index: {}]  }
   0x1   :  { %12 = vsyncpa [#allocation3 + $0x1], 0  ;;  %s575_s18 = smov 0   ;;  %s577_s19 = smov 0  }
   0x2   :  { %s579_s20 = smov 0   ;;  %s581_s21 = smov 0  }
   0x3   :  { %s583_s22 = smov 0   ;;  %s585_s23 = smov 0  }
   0x4 LB: > { %s386_s24 = sadd.s32 4294967295, %s540_s23   ;;  %s387_s25 = sadd.s32 4294967294, %s540_s23   ;;  %s540_s23 = sphi %s585_s23, %s18_s23   ;;  %s536_s22 = sphi %s583_s22, %s711_s22   ;;  %s532_s21 = sphi %s581_s21, %s710_s21   ;;  %s528_s20 = sphi %s579_s20, %s709_s20   ;;  %s524_s19 = sphi %s577_s19, %s708_s19   ;;  %s520_s18 = sphi %s575_s18, %s707_s18  }
   0x5   : > { %s30_s26 = sadd.s32 1, %s536_s22  ;;  %s149_s27 = sadd.s32 1, %s528_s20 }
   0x6   : > { %p32_p0 = scmp.ge.s32.totalorder %s30_s26, 2  ;;  %p159_p1 = scmp.ne.s32.totalorder %s528_s20, %s524_s19 }
   0x7   : > { %p160_p2 = scmp.eq.s32.totalorder %s386_s24, 1  ;;  %p165_p3 = scmp.ne.s32.totalorder %s524_s19, %s520_s18 }
   0x8   : > { %s713_s26 = smov (%p32_p0, %s30_s26), 0  ;;  %p166_p5 = scmp.eq.s32.totalorder %s387_s25, 1 }
   0x9   : > { %p615_p4 = por %p160_p2, %p159_p1  ;;  %s146_s29 = ssub.s32 %s536_s22, %s713_s26 }
   0xa   : > { %p390_p6 = scmp.ge.s32.totalorder %s540_s23, 1  ;;  %p147_p7 = scmp.eq.s32.totalorder %s146_s29, 0 }
   0xb   : > { %p622_p8 = por %p166_p5, %p165_p3  ;;  %p205_p9 = scmp.lt.s32.totalorder %s540_s23, 3 }
   0xc   : > { %s628_s6 = scalar_select %p147_p7, %s528_s20, %s149_s27  }
   0xd   : > { %p206_p10 = pnand %p390_p6, %p205_p9 }
   0xe   : > { %v245_v0 = vld [vmem:[%s700_s1] sm:$0xff] (!%p206_p10)  ;;  %v542_v2 = vmov (!%p206_p10), 0   ;;  %v543_v4 = vmov (!%p206_p10), 1   ;;  %p234_p11 = scmp.lt.s32.totalorder (!%p206_p10), %s532_s21, 1  ;;  %v249_v6 = vlaneseq (!%p206_p10)  ;;  %s393_s27 = sshll.u32 (!%p206_p10), %s532_s21, 7 }
   0xf   : > { %209 = sbr.rel (%p206_p10) target bundleno = 189 (0xbd), region = 40  ;;  %v246_v1 = vld [vmem:[%s701_s2] sm:$0xff] (!%p206_p10)  ;;  %456 = vset.pattern.permute.xlu0 (!%p206_p10), %v542_v2  ;;  %458 = vset.pattern.permute.xlu1 (!%p206_p10), %v542_v2  ;;  %s230_s29 = sand.u32 (!%p206_p10), 1, %s524_s19   ;;  %v296_v26 = vstv (!%p206_p10), %s393_s27 }
  0x10   : > { %255 = vperm.xlu0 (!%p206_p10), %456, %v245_v0   ;;  %274 = vperm.xlu1 (!%p206_p10), %458, %v246_v1   ;;  %v247_v3 = vld [vmem:[%s702_s3] sm:$0xff] (!%p206_p10)  ;;  %v250_v7 = vshrl.u32 (!%p206_p10), %v249_v6, 7  ;;  %v295_v25 = vand.u32 (!%p206_p10), 127, %v249_v6  ;;  %s391_s7 = sshll.u32 (!%p206_p10), %s230_s29, 3  ;;  %s652_s12 = scalar_lea.hbm (!%p206_p10), %s704_s5, %s393_s27 }
  0x11   : > { %v248_v5 = vld [vmem:[%s703_s4] sm:$0xff] (!%p206_p10)  ;;  %s232_s8 = scalar_lea.vmem (!%p206_p10), [#allocation2], %s391_s7  ;;  %s544_s14 = smov (!%p206_p10), [#allocation2]  }
  0x12   : > { %v251_v8 = vsub.s32 (!%p206_p10), 0, %v250_v7  ;;  %v263_v10 = vsub.s32 (!%p206_p10), 1, %v250_v7  ;;  %v297_v27 = vadd.s32 (!%p206_p10), %v296_v26, %v295_v25  ;;  %s319_s9 = sshll.u32 (!%p206_p10), %s232_s8, 4  ;;  %s654_s9 = int_to_ptr.vmem [resolvable:$true] %s319_s9 }
  0x13   : > { %s462_s13 = scalar_lea.vmem (!%p206_p10), %s654_s9, 128 }
  0x14   : > { %457 = vset.pattern.permute.xlu0 (!%p206_p10), %v543_v4  ;;  %280 = vperm.xlu1 (!%p206_p10), %458, %v247_v3   ;;  %vm298_vm0 = vcmp.lt.s32.totalorder (!%p206_p10), %v297_v27, 16  ;;  %p463_p12 = scmp.ne.s32.totalorder (!%p206_p10), %s654_s9, %s462_s13 }
  0x15   : > { %266 = vperm.xlu0 (!%p206_p10), %457, %v245_v0  }
  0x16   : > { %s235_s15 = scalar_select %p234_p11, %s532_s21, 1 }
  0x17   : > { %s306_s21 = scalar_lea.sflag [#allocation3], %s230_s29  ;;  %p464_p13 = pnand %p463_p12, %p615_p4 }
  0x18   : > { %288 = vperm.xlu1 %458, %v248_v5   ;;  %s392_s16 = sshll.u32 %s235_s15, 1  ;;  %s466_s15 = sshll.u32 %s544_s14, 4  ;;  %s467_s15 = int_to_ptr.vmem [resolvable:$false] %s466_s15 }
  0x19   : > { %459 = vset.pattern.permute.xlu0 %v542_v2  ;;  %s237_s25 = scalar_lea.vmem %s699_s0, %s392_s16  ;;  %p465_p0 = pneg %p464_p13 }
  0x1a   : > { %v244_v9 = vld [vmem:[%s237_s25] sm:$0x3]  ;;  %s468_s16 = scalar_lea.vmem %s467_s15, 256  ;;  %p469_p1 = scmp.lt.s32.totalorder %s654_s9, %s467_s15 }
  0x1b   : > { %v252_v12 = vrot.slane %v244_v9, %v251_v8  ;;  %v264_v13 = vrot.slane %v244_v9, %v263_v10  ;;  %p470_p2 = scmp.lt.s32.totalorder %s468_s16, %s462_s13 }
  0x1d   : > { %p471_p3 = por %p470_p2, %p469_p1 }
  0x1f   : > { %p472_p5 = pnand %p471_p3, %p465_p0 }
  0x8f   : > { %v256_v11 = vpop.permute.xlu0 %255  ;;  %v275_v17 = vpop.permute.xlu1 %274 }
  0x90   : > { %v258_v14 = vsub.f32 %v252_v12, %v256_v11 }
  0x92   : > { %v259_v18 = vmul.f32 %v258_v14, %v258_v14 }
  0x93   : > { %v281_v22 = vpop.permute.xlu1 %280 }
  0x94   : > { %v267_v15 = vpop.permute.xlu0 %266 }
  0x95   : > { %v269_v16 = vsub.f32 %v264_v13, %v267_v15 }
  0x97   : > { %v270_v19 = vmul.f32 %v269_v16, %v269_v16  ;;  %v289_v29 = vpop.permute.xlu1 %288 }
  0x99   : > { %v271_v20 = vadd.f32 %v270_v19, %v259_v18 }
  0x9b   : > { %v277_v21 = vmul.f32 %v275_v17, %v271_v20 }
  0x9d   : > { %v283_v23 = vadd.f32 %v281_v22, %v277_v21 }
  0x9f   : > { %v284_v24 = vmul.f32 1.442695, %v283_v23 }
  0xa1   : > { %460 = vpow2.f32 %v284_v24 }
  0xab   : > { %v461_v28 = vpop.eup %460 }
  0xac   : > { %v291_v30 = vmul.f32 %v461_v28, %v289_v29 }
  0xae   : > { %v301_v31 = vsel %vm298_vm0, %v291_v30, 0.0 }
  0xaf   : > { %304 = vst [vmem:[%s232_s8] sm:$0xff] %v301_v31 }
  0xb0   : > { %475 = shalt.err (!%p472_p5)
}
  0xb1   : > { %s476_s17 = scalar_lea.hbm %s652_s12, 128  ;;  %s480_s27 = scalar_lea.hbm %s704_s5, 256 }
  0xb2   : > { %p477_p6 = scmp.ne.s32.totalorder %s652_s12, %s476_s17  ;;  %p481_p10 = scmp.lt.u32.totalorder %s652_s12, %s704_s5 }
  0xb3   : > { %p482_p11 = scmp.lt.u32.totalorder %s480_s27, %s476_s17  ;;  %p484_p13 = scmp.lt.u32.totalorder %s476_s17, %s652_s12 }
  0xb4   : > { %p478_p7 = pnand %p477_p6, %p615_p4 }
  0xb5   : > { %p483_p12 = por %p482_p11, %p481_p10 }
  0xb6   : > { %p479_p9 = pneg %p478_p7 }
  0xb7   : > { %p485_p0 = por %p484_p13, %p483_p12 }
  0xb9   : > { %p486_p1 = pnand %p485_p0, %p479_p9 }
  0xbb   : > { %489 = shalt.err (!%p486_p1)
}
  0xbc   : > { %398 = dma.vmem_to_hbm [thread:$0]  (%p615_p4), %s654_s9, 128, %s652_s12, %s306_s21  }
  0xbd PF: > { %p404_p2 = scmp.ge.s32.totalorder %s540_s23, 2  ;;  %s331_s8 = sand.u32 1, %s520_s18  }
  0xbe   : > { %s332_s10 = scalar_lea.sflag [#allocation3], %s331_s8 }
  0xbf   : > { %p401_p3 = pnand %p404_p2, %p622_p8 }
  0xc1   : > { %515 = dma.done.wait (!%p401_p3), %s332_s10, 128  }
  0xc2   : > { %517 = vsyncadd (!%p401_p3), %s332_s10, 4294967168  ;;  %s18_s23 = sadd.s32 1, %s540_s23   ;;  %s707_s18 = smov %s524_s19 }
  0xc3   : > { %p15_p5 = scmp.ge.s32.totalorder %s18_s23, 4   ;;  %s708_s19 = smov %s528_s20 }
  0xc4   : > { %s709_s20 = smov %s628_s6  ;;  %s710_s21 = smov %s536_s22 }
  0xc5   : > { %s711_s22 = smov %s713_s26  ;;  %17 = sbr.rel (!%p15_p5) target bundleno = 4 (0x4), region = 79 }
  0xcc   :  { %337 = vsyncpa [#allocation3], 1 }
  0xcd   :  { %339 = vsyncpa [#allocation3 + $0x1], 1 }

</bundles_post_ra>
